<compile_context>
chip_gen: v7x
topology: tpu7x:2x2x1
jax: 0.10.0
libtpu: 0.0.40
codegen_flags: <defaults>
</compile_context>

<pallas_src>
import functools

import jax
import jax.numpy as jnp
from jax.experimental import pallas as pl
from jax.experimental.pallas import tpu as pltpu


_LANE = 128      # last-dim tile granularity (lane width)
_SUBLANE = 8     # second-to-last-dim tile granularity (f32 sublane)


def _round_up(n: int, m: int) -> int:
    return ((n + m - 1) // m) * m


# ---------------------------------------------------------------------------
# Kernel
# ---------------------------------------------------------------------------
def _make_mlp_kernel(num_linear: int):
    """Kernel signature: (x_ref, w0, b0, w1, b1, ..., o_ref).

    SiLU is applied after every layer except the last (matching Net.forward).
    Matmuls run in the weights' dtype (f32 or bf16) with f32 accumulation;
    bias add and SiLU are done in f32.
    """

    def kernel(*refs):
        x_ref = refs[0]
        o_ref = refs[-1]
        param_refs = refs[1:-1]

        h = x_ref[...]                              # (TM, in_pad) f32
        for layer in range(num_linear):
            w_ref = param_refs[2 * layer]
            b_ref = param_refs[2 * layer + 1]
            lhs = h if h.dtype == w_ref.dtype else h.astype(w_ref.dtype)
            h = jnp.dot(lhs, w_ref[...],
                        preferred_element_type=jnp.float32) + b_ref[...]
            if layer < num_linear - 1:
                # SiLU / swish in f32: x * sigmoid(x)
                h = h * jax.nn.sigmoid(h)
        o_ref[...] = h.astype(o_ref.dtype)

    return kernel


# ---------------------------------------------------------------------------
# One-time parameter preparation (transpose + pad + cast) — NOT per forward.
# ---------------------------------------------------------------------------
def prepare_params(params, matmul_dtype=jnp.float32):
    """params: list of (W, b) in PyTorch layout (out_features, in_features).

    Returns a flat tuple (W0', b0', W1', b1', ...) with:
      W' : (in_pad, out_pad)  zero-padded, transposed, cast to matmul_dtype
      b' : (1, out_pad)       zero-padded, float32
    where in_pad/out_pad are rounded up to multiples of 128.
    """
    prepared = []
    for (w, b) in params:
        out_f, in_f = w.shape
        in_pad = _round_up(in_f, _LANE)
        out_pad = _round_up(out_f, _LANE)
        wt = jnp.zeros((in_pad, out_pad), matmul_dtype)
        wt = wt.at[:in_f, :out_f].set(jnp.transpose(w).astype(matmul_dtype))
        b2 = jnp.zeros((1, out_pad), jnp.float32)
        b2 = b2.at[:, :out_f].set(b.astype(jnp.float32))
        prepared += [wt, b2]
    return tuple(prepared)


# ---------------------------------------------------------------------------
# Forward pass
# ---------------------------------------------------------------------------
@functools.partial(jax.jit, static_argnums=(1,))
def net_forward(x, n_outs, *prepared):
    """Full MLP forward in a single Pallas kernel, batch-tiled.

    x        : (batch, n_in) float32
    n_outs   : true (unpadded) output feature count (static)
    prepared : output of prepare_params()
    """
    assert len(prepared) % 2 == 0
    num_linear = len(prepared) // 2

    batch, n_in = x.shape
    n_in_pad = prepared[0].shape[0]
    n_out_pad = prepared[-2].shape[1]

    # Batch tile: sublane-aligned; cap at 256 rows per grid step.
    tm = 256 if batch >= 256 else _round_up(batch, _SUBLANE)
    batch_pad = _round_up(batch, tm)

    x_pad = x.astype(jnp.float32)
    if (batch_pad, n_in_pad) != (batch, n_in):
        x_pad = jnp.pad(x_pad, ((0, batch_pad - batch), (0, n_in_pad - n_in)))

    grid = (batch_pad // tm,)

    in_specs = [pl.BlockSpec((tm, n_in_pad), lambda i: (i, 0))]
    for layer in range(num_linear):
        w = prepared[2 * layer]
        b = prepared[2 * layer + 1]
        in_specs += [
            pl.BlockSpec(w.shape, lambda i: (0, 0)),   # weights resident
            pl.BlockSpec(b.shape, lambda i: (0, 0)),   # biases resident
        ]
    out_spec = pl.BlockSpec((tm, n_out_pad), lambda i: (i, 0))
    out_shape = jax.ShapeDtypeStruct((batch_pad, n_out_pad), jnp.float32)

    # Cost estimate (advisory, helps XLA scheduling around the custom call).
    flops = 0
    transcendentals = 0
    param_bytes = 0
    max_hidden = n_out_pad
    for layer in range(num_linear):
        w = prepared[2 * layer]
        b = prepared[2 * layer + 1]
        flops += 2 * batch_pad * w.shape[0] * w.shape[1]
        param_bytes += int(w.size) * w.dtype.itemsize + int(b.size) * 4
        max_hidden = max(max_hidden, w.shape[1])
        if layer < num_linear - 1:
            transcendentals += batch_pad * w.shape[1]
    io_bytes = int(x_pad.size) * 4 + batch_pad * n_out_pad * 4
    cost = pl.CostEstimate(flops=flops,
                           transcendentals=transcendentals,
                           bytes_accessed=io_bytes + param_bytes)

    # VMEM budget: resident params + double-buffered x/out tiles + largest
    # intermediate activation, with 2x headroom, capped at v7x's 64 MiB.
    tile_bytes = 2 * 4 * tm * (n_in_pad + n_out_pad)     # double-buffered
    act_bytes = 4 * tm * max_hidden
    vmem_limit = min(2 * (param_bytes + tile_bytes + act_bytes) + (8 << 20),
                     64 << 20)

    out = pl.pallas_call(
        _make_mlp_kernel(num_linear),
        out_shape=out_shape,
        grid_spec=pltpu.PrefetchScalarGridSpec(
            num_scalar_prefetch=0,
            grid=grid,
            in_specs=in_specs,
            out_specs=out_spec,
        ),
        compiler_params=pltpu.CompilerParams(
            dimension_semantics=("parallel",),
            vmem_limit_bytes=vmem_limit,
        ),
        cost_estimate=cost,
    )(x_pad, *prepared)

    return out[:batch, :n_outs]


# ---------------------------------------------------------------------------
# PyTorch-style init + pure-JAX reference
# ---------------------------------------------------------------------------
def init_net_params(key, n_in, n_outs, n_hidden, n_layers):
    """nn.Linear-style uniform(+-1/sqrt(fan_in)) init, PyTorch layout."""
    dims = [(n_in, n_hidden)]
    dims += [(n_hidden, n_hidden) for _ in range(1, n_layers)]
    dims += [(n_hidden, n_outs)]

    params = []
    for (fan_in, fan_out) in dims:
        key, kw, kb = jax.random.split(key, 3)
        bound = 1.0 / jnp.sqrt(jnp.float32(fan_in))
        w = jax.random.uniform(kw, (fan_out, fan_in), jnp.float32, -bound, bound)
        b = jax.random.uniform(kb, (fan_out,), jnp.float32, -bound, bound)
        params.append((w, b))
    return params


def net_forward_reference(x, params):
    """Pure-JAX f32 reference of Net.forward (PyTorch-layout params)."""
    h = x
    for layer, (w, b) in enumerate(params):
        h = h @ w.T + b
        if layer < len(params) - 1:
            h = h * jax.nn.sigmoid(h)
    return h


# TODO(synk): Net.fit / grad_regularization / mse_loss are training-time
# autograd+optimizer code with no forward-pass Pallas equivalent; only the
# forward pass is implemented here.

if __name__ == "__main__":
    batch, n_in, n_hidden, n_layers, n_outs = 8, 16, 32, 2, 8

    key = jax.random.PRNGKey(0)
    key, kx = jax.random.split(key)
    x = jax.random.normal(kx, (batch, n_in), jnp.float32)

    params = init_net_params(key, n_in, n_outs, n_hidden, n_layers)
    ref = net_forward_reference(x, params)

    # f32 matmul path (exact vs reference).
    prepared_f32 = prepare_params(params, jnp.float32)
    out_f32 = jax.block_until_ready(net_forward(x, n_outs, *prepared_f32))
    assert out_f32.shape == (batch, n_outs), out_f32.shape
    assert jnp.allclose(out_f32, ref, atol=1e-5, rtol=1e-5), (
        float(jnp.max(jnp.abs(out_f32 - ref)))
    )

    # bf16 matmul inputs, f32 accumulation (the v6e/v7x MXU fast path).
    prepared_bf16 = prepare_params(params, jnp.bfloat16)
    out_bf16 = jax.block_until_ready(net_forward(x, n_outs, *prepared_bf16))
    assert out_bf16.shape == (batch, n_outs), out_bf16.shape
    assert jnp.allclose(out_bf16, ref, atol=5e-2, rtol=5e-2), (
        float(jnp.max(jnp.abs(out_bf16 - ref)))
    )

    print("KERNEL_OK")
</pallas_src>

<mosaic_0001>
module attributes {stable_mosaic.version = 11 : i64} {
  func.func @kernel(%arg0: i32, %arg1: memref<8x128xf32, #tpu.memory_space<vmem>>, %arg2: memref<128x128xf32, #tpu.memory_space<vmem>>, %arg3: memref<1x128xf32, #tpu.memory_space<vmem>>, %arg4: memref<128x128xf32, #tpu.memory_space<vmem>>, %arg5: memref<1x128xf32, #tpu.memory_space<vmem>>, %arg6: memref<128x128xf32, #tpu.memory_space<vmem>>, %arg7: memref<1x128xf32, #tpu.memory_space<vmem>>, %arg8: memref<8x128xf32, #tpu.memory_space<vmem>>) attributes {dimension_semantics = [#tpu.dimension_semantics<parallel>], iteration_bounds = array<i64: 1>, scalar_prefetch = 0 : i64, scratch_operands = 0 : i64, tpu.core_type = #tpu.core_type<tc>, window_params = [{transform_indices = @transform_0, window_bounds = array<i64: 8, 128>}, {pipeline_mode = #tpu.pipeline_mode<synchronous>, transform_indices = @transform_1, window_bounds = array<i64: 128, 128>}, {pipeline_mode = #tpu.pipeline_mode<synchronous>, transform_indices = @transform_2, window_bounds = array<i64: 1, 128>}, {pipeline_mode = #tpu.pipeline_mode<synchronous>, transform_indices = @transform_3, window_bounds = array<i64: 128, 128>}, {pipeline_mode = #tpu.pipeline_mode<synchronous>, transform_indices = @transform_4, window_bounds = array<i64: 1, 128>}, {pipeline_mode = #tpu.pipeline_mode<synchronous>, transform_indices = @transform_5, window_bounds = array<i64: 128, 128>}, {pipeline_mode = #tpu.pipeline_mode<synchronous>, transform_indices = @transform_6, window_bounds = array<i64: 1, 128>}, {transform_indices = @transform_7, window_bounds = array<i64: 8, 128>}]} {
    %c0 = arith.constant 0 : index
    %c0_0 = arith.constant 0 : index
    %0 = vector.load %arg1[%c0, %c0_0] : memref<8x128xf32, #tpu.memory_space<vmem>>, vector<8x128xf32>
    %c0_1 = arith.constant 0 : index
    %c0_2 = arith.constant 0 : index
    %1 = vector.load %arg2[%c0_1, %c0_2] : memref<128x128xf32, #tpu.memory_space<vmem>>, vector<128x128xf32>
    %cst = arith.constant dense<0.000000e+00> : vector<8x128xf32>
    %2 = tpu.matmul %0, %1, %cst {dimension_numbers = #tpu.dot_dimension_numbers<[1], [0], [0], [1], [0, 0, 1, 1], [], []>} : vector<8x128xf32>, vector<128x128xf32>, vector<8x128xf32> -> vector<8x128xf32>
    %c0_3 = arith.constant 0 : index
    %c0_4 = arith.constant 0 : index
    %3 = vector.load %arg3[%c0_3, %c0_4] : memref<1x128xf32, #tpu.memory_space<vmem>>, vector<1x128xf32>
    %4 = vector.broadcast %3 : vector<1x128xf32> to vector<8x128xf32>
    %5 = arith.addf %2, %4 : vector<8x128xf32>
    %6 = arith.negf %5 : vector<8x128xf32>
    %7 = math.exp %6 : vector<8x128xf32>
    %cst_5 = arith.constant 1.000000e+00 : f32
    %8 = vector.broadcast %cst_5 : f32 to vector<8x128xf32>
    %9 = arith.addf %8, %7 : vector<8x128xf32>
    %10 = arith.divf %8, %9 : vector<8x128xf32>
    %11 = arith.mulf %5, %10 : vector<8x128xf32>
    %c0_6 = arith.constant 0 : index
    %c0_7 = arith.constant 0 : index
    %12 = vector.load %arg4[%c0_6, %c0_7] : memref<128x128xf32, #tpu.memory_space<vmem>>, vector<128x128xf32>
    %cst_8 = arith.constant dense<0.000000e+00> : vector<8x128xf32>
    %13 = tpu.matmul %11, %12, %cst_8 {dimension_numbers = #tpu.dot_dimension_numbers<[1], [0], [0], [1], [0, 0, 1, 1], [], []>} : vector<8x128xf32>, vector<128x128xf32>, vector<8x128xf32> -> vector<8x128xf32>
    %c0_9 = arith.constant 0 : index
    %c0_10 = arith.constant 0 : index
    %14 = vector.load %arg5[%c0_9, %c0_10] : memref<1x128xf32, #tpu.memory_space<vmem>>, vector<1x128xf32>
    %15 = vector.broadcast %14 : vector<1x128xf32> to vector<8x128xf32>
    %16 = arith.addf %13, %15 : vector<8x128xf32>
    %17 = arith.negf %16 : vector<8x128xf32>
    %18 = math.exp %17 : vector<8x128xf32>
    %cst_11 = arith.constant 1.000000e+00 : f32
    %19 = vector.broadcast %cst_11 : f32 to vector<8x128xf32>
    %20 = arith.addf %19, %18 : vector<8x128xf32>
    %21 = arith.divf %19, %20 : vector<8x128xf32>
    %22 = arith.mulf %16, %21 : vector<8x128xf32>
    %c0_12 = arith.constant 0 : index
    %c0_13 = arith.constant 0 : index
    %23 = vector.load %arg6[%c0_12, %c0_13] : memref<128x128xf32, #tpu.memory_space<vmem>>, vector<128x128xf32>
    %cst_14 = arith.constant dense<0.000000e+00> : vector<8x128xf32>
    %24 = tpu.matmul %22, %23, %cst_14 {dimension_numbers = #tpu.dot_dimension_numbers<[1], [0], [0], [1], [0, 0, 1, 1], [], []>} : vector<8x128xf32>, vector<128x128xf32>, vector<8x128xf32> -> vector<8x128xf32>
    %c0_15 = arith.constant 0 : index
    %c0_16 = arith.constant 0 : index
    %25 = vector.load %arg7[%c0_15, %c0_16] : memref<1x128xf32, #tpu.memory_space<vmem>>, vector<1x128xf32>
    %26 = vector.broadcast %25 : vector<1x128xf32> to vector<8x128xf32>
    %27 = arith.addf %24, %26 : vector<8x128xf32>
    %c0_17 = arith.constant 0 : index
    %c0_18 = arith.constant 0 : index
    %28 = vector.load %arg8[%c0_17, %c0_18] : memref<8x128xf32, #tpu.memory_space<vmem>>, vector<8x128xf32>
    tpu.vector_store %arg8[%c0_17, %c0_18], %27 {strides = array<i32>} : memref<8x128xf32, #tpu.memory_space<vmem>>, vector<8x128xf32>,
    return
  }
  func.func @transform_0(%arg0: i32) -> (i32, i32) {
    %c0_i32 = arith.constant 0 : i32
    %c0_i32_0 = arith.constant 0 : i32
    return %arg0, %c0_i32 : i32, i32
  }
  func.func @transform_1(%arg0: i32) -> (i32, i32) {
    %c0_i32 = arith.constant 0 : i32
    %c0_i32_0 = arith.constant 0 : i32
    %c0_i32_1 = arith.constant 0 : i32
    return %c0_i32, %c0_i32_0 : i32, i32
  }
  func.func @transform_2(%arg0: i32) -> (i32, i32) {
    %c0_i32 = arith.constant 0 : i32
    %c0_i32_0 = arith.constant 0 : i32
    %c0_i32_1 = arith.constant 0 : i32
    return %c0_i32, %c0_i32_0 : i32, i32
  }
  func.func @transform_3(%arg0: i32) -> (i32, i32) {
    %c0_i32 = arith.constant 0 : i32
    %c0_i32_0 = arith.constant 0 : i32
    %c0_i32_1 = arith.constant 0 : i32
    return %c0_i32, %c0_i32_0 : i32, i32
  }
  func.func @transform_4(%arg0: i32) -> (i32, i32) {
    %c0_i32 = arith.constant 0 : i32
    %c0_i32_0 = arith.constant 0 : i32
    %c0_i32_1 = arith.constant 0 : i32
    return %c0_i32, %c0_i32_0 : i32, i32
  }
  func.func @transform_5(%arg0: i32) -> (i32, i32) {
    %c0_i32 = arith.constant 0 : i32
    %c0_i32_0 = arith.constant 0 : i32
    %c0_i32_1 = arith.constant 0 : i32
    return %c0_i32, %c0_i32_0 : i32, i32
  }
  func.func @transform_6(%arg0: i32) -> (i32, i32) {
    %c0_i32 = arith.constant 0 : i32
    %c0_i32_0 = arith.constant 0 : i32
    %c0_i32_1 = arith.constant 0 : i32
    return %c0_i32, %c0_i32_0 : i32, i32
  }
  func.func @transform_7(%arg0: i32) -> (i32, i32) {
    %c0_i32 = arith.constant 0 : i32
    %c0_i32_0 = arith.constant 0 : i32
    return %arg0, %c0_i32 : i32, i32
  }
}

</mosaic_0001>

<bundles_post_ra>
// kernel: net_forward.1
= control target key start
LH: loop header
LB: loop body
LE: loop exit
PB: predicated region body
PF: predicated region fallthrough
CT: control target
= control target key end

     0   :  { %12 = vsyncpa [#allocation3], 0  ;;  %s875_s0 = inlined_call_operand.vmem [shape: f32[8,128], index: 0, kind: input, shape index: {}]   ;;  %s876_s1 = inlined_call_operand.hbm [shape: f32[128,128], index: 1, kind: input, shape index: {}]   ;;  %s877_s2 = inlined_call_operand.vmem [shape: f32[1,128], index: 2, kind: input, shape index: {}]   ;;  %s878_s3 = inlined_call_operand.hbm [shape: f32[128,128], index: 3, kind: input, shape index: {}]   ;;  %s879_s4 = inlined_call_operand.vmem [shape: f32[1,128], index: 4, kind: input, shape index: {}]   ;;  %s880_s5 = inlined_call_operand.hbm [shape: f32[128,128], index: 5, kind: input, shape index: {}]   ;;  %s881_s6 = inlined_call_operand.vmem [shape: f32[1,128], index: 6, kind: input, shape index: {}]   ;;  %s882_s7 = inlined_call_operand.hbm [shape: f32[8,128], index: 7, kind: output, shape index: {}]  }
   0x1   :  { %13 = vsyncpa [#allocation6], 0 }
   0x2   :  { %14 = vsyncpa [#allocation4], 0  ;;  %s723_s24 = smov [#allocation5]   ;;  %s724_s26 = smov [#allocation2]  }
   0x3   :  { %s36_s25 = sshll.u32 %s723_s24, 4  ;;  %s22_s27 = sshll.u32 %s724_s26, 4  ;;  %s37_s25 = int_to_ptr.vmem [resolvable:$true] %s36_s25  ;;  %s772_s27 = int_to_ptr.vmem [resolvable:$true] %s22_s27 }
   0x4   :  { %s629_s30 = scalar_lea.hbm %s878_s3, 2048 }
   0x5   :  { %p630_p0 = scmp.ne.s32.totalorder %s878_s3, %s629_s30  ;;  %p633_p1 = scmp.lt.u32.totalorder %s629_s30, %s878_s3 }
   0x7   :  { %p635_p2 = pnand %p633_p1, %p630_p0 }
   0x9   :  { %638 = shalt.err (!%p635_p2)
}
   0xa   :  { %s639_s12 = scalar_lea.vmem %s37_s25, 2048  ;;  %p644_p4 = scmp.lt.s32.totalorder %s37_s25, %s37_s25 }
   0xb   :  { %p640_p3 = scmp.ne.s32.totalorder %s37_s25, %s639_s12  ;;  %p645_p5 = scmp.lt.s32.totalorder %s639_s12, %s639_s12 }
   0xd   :  { %p646_p6 = por %p645_p5, %p644_p4 }
   0xf   :  { %p647_p7 = pnand %p646_p6, %p640_p3 }
  0x11   :  { %650 = shalt.err (!%p647_p7)
}
  0x12   :  { %s725_s13 = smov 128   ;;  %s726_s14 = smov 8  }
  0x13   :  { %42 = dma.hbm_to_vmem [thread:$0]  %s878_s3, 2048, %s37_s25, [#allocation6], %s725_s13, %s725_s13, %s726_s14  }
  0x14   :  { %s651_s19 = scalar_lea.hbm %s876_s1, 2048 }
  0x15   :  { %p652_p8 = scmp.ne.s32.totalorder %s876_s1, %s651_s19  ;;  %p655_p9 = scmp.lt.u32.totalorder %s651_s19, %s876_s1 }
  0x17   :  { %p657_p10 = pnand %p655_p9, %p652_p8 }
  0x19   :  { %660 = shalt.err (!%p657_p10)
}
  0x1a   :  { %s661_s24 = scalar_lea.vmem %s772_s27, 2048  ;;  %p666_p12 = scmp.lt.s32.totalorder %s772_s27, %s772_s27 }
  0x1b   :  { %p662_p11 = scmp.ne.s32.totalorder %s772_s27, %s661_s24  ;;  %p667_p13 = scmp.lt.s32.totalorder %s661_s24, %s661_s24 }
  0x1d   :  { %p668_p0 = por %p667_p13, %p666_p12 }
  0x1f   :  { %p669_p1 = pnand %p668_p0, %p662_p11 }
  0x21   :  { %672 = shalt.err (!%p669_p1)
}
  0x22   :  { %28 = dma.hbm_to_vmem [thread:$0]  %s876_s1, 2048, %s772_s27, [#allocation3], %s725_s13, %s725_s13, %s726_s14  }
  0x23   :  { %s727_s26 = smov [#allocation7]   ;;  %s673_s8 = scalar_lea.hbm %s880_s5, 2048 }
  0x24   :  { %s50_s28 = sshll.u32 %s727_s26, 4  ;;  %p674_p2 = scmp.ne.s32.totalorder %s880_s5, %s673_s8  ;;  %s51_s28 = int_to_ptr.vmem [resolvable:$true] %s50_s28 }
  0x25   :  { %p677_p3 = scmp.lt.u32.totalorder %s673_s8, %s880_s5 }
  0x27   :  { %p679_p4 = pnand %p677_p3, %p674_p2 }
  0x29   :  { %682 = shalt.err (!%p679_p4)
}
  0x2a   :  { %s683_s15 = scalar_lea.vmem %s51_s28, 2048  ;;  %p688_p6 = scmp.lt.s32.totalorder %s51_s28, %s51_s28 }
  0x2b   :  { %p684_p5 = scmp.ne.s32.totalorder %s51_s28, %s683_s15  ;;  %p689_p7 = scmp.lt.s32.totalorder %s683_s15, %s683_s15 }
  0x2d   :  { %p690_p8 = por %p689_p7, %p688_p6 }
  0x2f   :  { %p691_p9 = pnand %p690_p8, %p684_p5 }
  0x31   :  { %694 = shalt.err (!%p691_p9)
}
  0x32   :  { %56 = dma.hbm_to_vmem [thread:$0]  %s880_s5, 2048, %s51_s28, [#allocation6], %s725_s13, %s725_s13, %s726_s14  }
  0x33   :  { %717 = dma.done.wait [#allocation3], 2048  }
  0x34   :  { %718 = vsyncadd [#allocation3], 4294965248 }
  0x35   :  { %719 = dma.done.wait [#allocation6], 4096  }
  0x36   :  { %720 = vsyncadd [#allocation6], 4294963200  ;;  %v728_v0 = vmov 0.0|0.0   ;;  %vm729_vm0 = vmmov 0   ;;  %v730_v1 = vmov 0.0   ;;  %v69_v2 = vld [vmem:[#allocation2] sm:$0xff] }
  0x37   :  { %540 = vmatprep.subr.bf16.mxu0 %v728_v0  ;;  %467 = vmatprep.mubr.msk.f32.mxu0 %vm729_vm0, %v730_v1  ;;  %v70_v3 = vld [vmem:[#allocation2 + $0x8] sm:$0xff]  ;;  %v71_v4 = vld [vmem:[#allocation2 + $0x10] sm:$0xff]  ;;  %v72_v6 = vld [vmem:[#allocation2 + $0x18] sm:$0xff]  ;;  %s731_s19 = smov [#allocation8]  }
  0x38   :  { %564 = vmatprep.subr.bf16.mxu1 %v728_v0  ;;  %502 = vmatprep.mubr.msk.f32.mxu1 %vm729_vm0, %v730_v1  ;;  %v541_v5 = vpack.c.bf16 %v70_v3, %v69_v2  ;;  %v544_v7 = vpack.c.bf16 %v72_v6, %v71_v4  ;;  %v73_v8 = vld [vmem:[#allocation2 + $0x20] sm:$0xff]  ;;  %v74_v9 = vld [vmem:[#allocation2 + $0x28] sm:$0xff]  ;;  %v75_v11 = vld [vmem:[#allocation2 + $0x30] sm:$0xff]  ;;  %s369_s20 = sshll.u32 %s731_s19, 4  ;;  %s370_s20 = int_to_ptr.vmem [resolvable:$true] %s369_s20 }
  0x39   :  { %v547_v10 = vpack.c.bf16 %v74_v9, %v73_v8  ;;  %v76_v12 = vld [vmem:[#allocation2 + $0x38] sm:$0xff]  ;;  %v77_v14 = vld [vmem:[#allocation2 + $0x40] sm:$0xff]  ;;  %v78_v15 = vld [vmem:[#allocation2 + $0x48] sm:$0xff]  ;;  %p700_p11 = scmp.lt.s32.totalorder %s370_s20, %s370_s20 }
  0x3a   :  { %542 = vmatpush3.bf16.msra.mxu0 %v541_v5  ;;  %v550_v13 = vpack.c.bf16 %v76_v12, %v75_v11  ;;  %v553_v16 = vpack.c.bf16 %v78_v15, %v77_v14  ;;  %v79_v17 = vld [vmem:[#allocation2 + $0x50] sm:$0xff]  ;;  %v80_v18 = vld [vmem:[#allocation2 + $0x58] sm:$0xff]  ;;  %v81_v20 = vld [vmem:[#allocation2 + $0x60] sm:$0xff] }
  0x3b   :  { %543 = vmatprep.subr.bf16.mxu0 %v728_v0  ;;  %v556_v19 = vpack.c.bf16 %v80_v18, %v79_v17  ;;  %v82_v21 = vld [vmem:[#allocation2 + $0x68] sm:$0xff]  ;;  %v83_v23 = vld [vmem:[#allocation2 + $0x70] sm:$0xff]  ;;  %v84_v24 = vld [vmem:[#allocation2 + $0x78] sm:$0xff] }
  0x3c   :  { %v559_v22 = vpack.c.bf16 %v82_v21, %v81_v20  ;;  %v562_v25 = vpack.c.bf16 %v84_v24, %v83_v23  ;;  %v68_v26 = vld [vmem:[%s875_s0] sm:$0xff]  ;;  %v170_v28 = vld [vmem:[#allocation5 + $0x8] sm:$0xff]  ;;  %v171_v30 = vld [vmem:[#allocation5 + $0x10] sm:$0xff] }
  0x3d   :  { %v169_v27 = vld [vmem:[#allocation5] sm:$0xff]  ;;  %v172_v31 = vld [vmem:[#allocation5 + $0x18] sm:$0xff]  ;;  %v174_v34 = vld [vmem:[#allocation5 + $0x28] sm:$0xff] }
  0x3e   :  { %545 = vmatpush3.bf16.msra.mxu0 %v544_v7  ;;  %v565_v29 = vpack.c.bf16 %v170_v28, %v169_v27  ;;  %v568_v32 = vpack.c.bf16 %v172_v31, %v171_v30  ;;  %v173_v33 = vld [vmem:[#allocation5 + $0x20] sm:$0xff]  ;;  %v175_v36 = vld [vmem:[#allocation5 + $0x30] sm:$0xff]  ;;  %v176_v37 = vld [vmem:[#allocation5 + $0x38] sm:$0xff] }
  0x3f   :  { %546 = vmatprep.subr.bf16.mxu0 %v728_v0  ;;  %v571_v35 = vpack.c.bf16 %v174_v34, %v173_v33  ;;  %v574_v38 = vpack.c.bf16 %v176_v37, %v175_v36  ;;  %v177_v39 = vld [vmem:[#allocation5 + $0x40] sm:$0xff]  ;;  %v178_v40 = vld [vmem:[#allocation5 + $0x48] sm:$0xff]  ;;  %v179_v42 = vld [vmem:[#allocation5 + $0x50] sm:$0xff] }
  0x40   :  { %566 = vmatpush3.bf16.msra.mxu1 %v565_v29  ;;  %v577_v41 = vpack.c.bf16 %v178_v40, %v177_v39  ;;  %v180_v43 = vld [vmem:[#allocation5 + $0x58] sm:$0xff]  ;;  %v181_v45 = vld [vmem:[#allocation5 + $0x60] sm:$0xff]  ;;  %v182_v46 = vld [vmem:[#allocation5 + $0x68] sm:$0xff] }
  0x41   :  { %567 = vmatprep.subr.bf16.mxu1 %v728_v0  ;;  %v580_v44 = vpack.c.bf16 %v180_v43, %v179_v42  ;;  %v583_v47 = vpack.c.bf16 %v182_v46, %v181_v45  ;;  %v183_v48 = vld [vmem:[#allocation5 + $0x70] sm:$0xff]  ;;  %v184_v49 = vld [vmem:[#allocation5 + $0x78] sm:$0xff]  ;;  %v379_v51 = vld [vmem:[%s877_s2] ss:$0 sm:$0xff] }
  0x42   :  { %548 = vmatpush3.bf16.msra.mxu0 %v547_v10  ;;  %v586_v50 = vpack.c.bf16 %v184_v49, %v183_v48  ;;  %v269_v60 = vld [vmem:[#allocation7] sm:$0xff]  ;;  %v270_v61 = vld [vmem:[#allocation7 + $0x8] sm:$0xff]  ;;  %v271_v63 = vld [vmem:[#allocation7 + $0x10] sm:$0xff] }
  0x43   :  { %549 = vmatprep.subr.bf16.mxu0 %v728_v0  ;;  %v589_v62 = vpack.c.bf16 %v270_v61, %v269_v60  ;;  %v273_v3 = vld [vmem:[#allocation7 + $0x20] sm:$0xff]  ;;  %v274_v4 = vld [vmem:[#allocation7 + $0x28] sm:$0xff]  ;;  %v275_v6 = vld [vmem:[#allocation7 + $0x30] sm:$0xff] }
  0x44   :  { %569 = vmatpush3.bf16.msra.mxu1 %v568_v32  ;;  %v595_v5 = vpack.c.bf16 %v274_v4, %v273_v3  ;;  %v276_v7 = vld [vmem:[#allocation7 + $0x38] sm:$0xff]  ;;  %v277_v9 = vld [vmem:[#allocation7 + $0x40] sm:$0xff]  ;;  %v278_v10 = vld [vmem:[#allocation7 + $0x48] sm:$0xff] }
  0x45   :  { %570 = vmatprep.subr.bf16.mxu1 %v728_v0  ;;  %v598_v8 = vpack.c.bf16 %v276_v7, %v275_v6  ;;  %v601_v11 = vpack.c.bf16 %v278_v10, %v277_v9  ;;  %v279_v12 = vld [vmem:[#allocation7 + $0x50] sm:$0xff]  ;;  %v281_v15 = vld [vmem:[#allocation7 + $0x60] sm:$0xff] }
  0x46   :  { %551 = vmatpush3.bf16.msra.mxu0 %v550_v13  ;;  %v280_v13 = vld [vmem:[#allocation7 + $0x58] sm:$0xff]  ;;  %v283_v18 = vld [vmem:[#allocation7 + $0x70] sm:$0xff]  ;;  %v381_v21 = vld [vmem:[%s879_s4] ss:$0 sm:$0xff]  ;;  %s695_s4 = scalar_lea.vmem %s370_s20, 128 }
  0x47   :  { %552 = vmatprep.subr.bf16.mxu0 %v728_v0  ;;  %v604_v14 = vpack.c.bf16 %v280_v13, %v279_v12  ;;  %p696_p10 = scmp.ne.s32.totalorder %s370_s20, %s695_s4  ;;  %p701_p12 = scmp.lt.s32.totalorder %s695_s4, %s695_s4 }
  0x48   :  { %572 = vmatpush3.bf16.msra.mxu1 %v571_v35 }
  0x49   :  { %573 = vmatprep.subr.bf16.mxu1 %v728_v0  ;;  %p702_p13 = por %p701_p12, %p700_p11 }
  0x4a   :  { %554 = vmatpush3.bf16.msra.mxu0 %v553_v16  ;;  %v282_v16 = vld [vmem:[#allocation7 + $0x68] sm:$0xff] }
  0x4b   :  { %555 = vmatprep.subr.bf16.mxu0 %v728_v0  ;;  %v607_v17 = vpack.c.bf16 %v282_v16, %v281_v15  ;;  %p703_p0 = pnand %p702_p13, %p696_p10 }
  0x4c   :  { %575 = vmatpush3.bf16.msra.mxu1 %v574_v38 }
  0x4d   :  { %576 = vmatprep.subr.bf16.mxu1 %v728_v0 }
  0x4e   :  { %557 = vmatpush3.bf16.msra.mxu0 %v556_v19  ;;  %v284_v19 = vld [vmem:[#allocation7 + $0x78] sm:$0xff] }
  0x4f   :  { %558 = vmatprep.subr.bf16.mxu0 %v728_v0  ;;  %v610_v20 = vpack.c.bf16 %v284_v19, %v283_v18 }
  0x50   :  { %578 = vmatpush3.bf16.msra.mxu1 %v577_v41 }
  0x51   :  { %579 = vmatprep.subr.bf16.mxu1 %v728_v0 }
  0x52   :  { %560 = vmatpush3.bf16.msra.mxu0 %v559_v22 }
  0x53   :  { %561 = vmatprep.subr.bf16.mxu0 %v728_v0 }
  0x54   :  { %581 = vmatpush3.bf16.msra.mxu1 %v580_v44 }
  0x55   :  { %582 = vmatprep.subr.bf16.mxu1 %v728_v0 }
  0x56   :  { %563 = vmatpush3.bf16.msra.mxu0 %v562_v25 }
  0x57   :  { %588 = vmatprep.subr.bf16.mxu0 %v728_v0 }
  0x58   :  { %584 = vmatpush3.bf16.msra.mxu1 %v583_v47 }
  0x59   :  { %468 = vmatmul.mubr.f32.vlgmr.msra.gmra.mrb[0].mxu0 %v68_v26  ;;  %585 = vmatprep.subr.bf16.mxu1 %v728_v0 }
  0x5a   :  { %537 = vmatprep.mubr.msk.f32.mxu0 %vm729_vm0, %v730_v1  ;;  %590 = vmatpush3.bf16.msra.mxu0 %v589_v62  ;;  %v272_v1 = vld [vmem:[#allocation7 + $0x18] sm:$0xff] }
  0x5b   :  { %591 = vmatprep.subr.bf16.mxu0 %v728_v0  ;;  %v592_v2 = vpack.c.bf16 %v272_v1, %v271_v63 }
  0x5c   :  { %587 = vmatpush3.bf16.msra.mxu1 %v586_v50 }
  0x5e   :  { %593 = vmatpush3.bf16.msra.mxu0 %v592_v2 }
  0x5f   :  { %594 = vmatprep.subr.bf16.mxu0 %v728_v0 }
  0x62   :  { %596 = vmatpush3.bf16.msra.mxu0 %v595_v5 }
  0x63   :  { %597 = vmatprep.subr.bf16.mxu0 %v728_v0 }
  0x66   :  { %599 = vmatpush3.bf16.msra.mxu0 %v598_v8 }
  0x67   :  { %600 = vmatprep.subr.bf16.mxu0 %v728_v0 }
  0x6a   :  { %602 = vmatpush3.bf16.msra.mxu0 %v601_v11 }
  0x6b   :  { %603 = vmatprep.subr.bf16.mxu0 %v728_v0 }
  0x6e   :  { %605 = vmatpush3.bf16.msra.mxu0 %v604_v14 }
  0x6f   :  { %606 = vmatprep.subr.bf16.mxu0 %v728_v0 }
  0x72   :  { %608 = vmatpush3.bf16.msra.mxu0 %v607_v17 }
  0x73   :  { %609 = vmatprep.subr.bf16.mxu0 %v728_v0  ;;  %v383_v0 = vld [vmem:[%s881_s6] ss:$0 sm:$0xff] }
  0x76   :  { %611 = vmatpush3.bf16.msra.mxu0 %v610_v20 }
 0x12c   :  { %v158_v52 = vpop.f32.mrb[0].mxu0 }
 0x12d   :  { %v159_v53 = vadd.f32 %v379_v51, %v158_v52  ;;  %v469_v54 = vpop.f32.mrb[1].mxu0 }
 0x12f   :  { %v380_v55 = vmul.f32 -1.442695, %v159_v53 }
 0x131   :  { %621 = vpow2.f32 %v380_v55 }
 0x13b   :  { %v622_v56 = vpop.eup %621 }
 0x13c   :  { %v165_v57 = vadd.f32 1.0, %v622_v56 }
 0x13e   :  { %623 = vrcp.f32 %v165_v57 }
 0x148   :  { %v624_v58 = vpop.eup %623 }
 0x149   :  { %v168_v59 = vmul.f32 %v624_v58, %v159_v53 }
 0x14b   :  { %503 = vmatmul.mubr.f32.vlgmr.msra.gmra.mrb[0].mxu1 %v168_v59 }
 0x21e   :  { %v258_v22 = vpop.f32.mrb[0].mxu1 }
 0x21f   :  { %v259_v23 = vadd.f32 %v381_v21, %v258_v22  ;;  %v504_v24 = vpop.f32.mrb[1].mxu1 }
 0x221   :  { %v382_v25 = vmul.f32 -1.442695, %v259_v23 }
 0x223   :  { %625 = vpow2.f32 %v382_v25 }
 0x22d   :  { %v626_v26 = vpop.eup %625 }
 0x22e   :  { %v265_v27 = vadd.f32 1.0, %v626_v26 }
 0x230   :  { %627 = vrcp.f32 %v265_v27 }
 0x23a   :  { %v628_v28 = vpop.eup %627 }
 0x23b   :  { %v268_v29 = vmul.f32 %v628_v28, %v259_v23 }
 0x23d   :  { %538 = vmatmul.mubr.f32.vlgmr.msra.gmra.mrb[2].mxu0 %v268_v29 }
 0x310   :  { %v358_v30 = vpop.f32.mrb[2].mxu0 }
 0x311   :  { %v359_v31 = vadd.f32 %v383_v0, %v358_v30  ;;  %v539_v32 = vpop.f32.mrb[3].mxu0 }
 0x313   :  { %362 = vst [vmem:[#allocation8] sm:$0xff] %v359_v31 }
 0x314   :  { %706 = shalt.err (!%p703_p0)
}
 0x315   :  { %s707_s23 = scalar_lea.hbm %s882_s7, 128 }
 0x316   :  { %p708_p1 = scmp.ne.s32.totalorder %s882_s7, %s707_s23  ;;  %p711_p2 = scmp.lt.u32.totalorder %s707_s23, %s882_s7 }
 0x318   :  { %p713_p3 = pnand %p711_p2, %p708_p1 }
 0x31a   :  { %716 = shalt.err (!%p713_p3)
}
 0x31b   :  { %372 = dma.vmem_to_hbm [thread:$0]  %s370_s20, 128, %s882_s7, [#allocation4]  }
 0x31c   :  { %721 = dma.done.wait [#allocation4], 128  }
 0x31d   :  { %722 = vsyncadd [#allocation4], 4294967168 }
 0x31e   :  { %376 = vsyncpa [#allocation3], 1 }
 0x31f   :  { %377 = vsyncpa [#allocation6], 1 }
 0x320   :  { %378 = vsyncpa [#allocation4], 1 }

</bundles_post_ra>
